<compile_context>
chip_gen: v7x
topology: tpu7x:2x2x1
jax: 0.10.0
libtpu: 0.0.40
codegen_flags: <defaults>
</compile_context>

<pallas_src>
import jax
import jax.numpy as jnp
from jax.experimental import pallas as pl
from jax.experimental.pallas import tpu as pltpu

# ------------------------- problem sizes (small, synthetic) -----------------
B = 2            # batch_size
F = 128          # num_subcarriers (fft_size)           -> lane dim
T = 8            # num_ofdm_symbols
R = 2            # num_rx_ant
NUM_TX = 1       # single transmitter / single stream
PILOT_SYM = 2    # DMRS OFDM symbol index
P = F // 2       # comb-2 DMRS -> pilots on every other subcarrier
BITS_PER_SYM = 2 # QPSK
T_DATA = T - 1   # data-carrying OFDM symbols
TB_SIZE = T_DATA * F * BITS_PER_SYM

M_PAD = 8        # B*R = 4 rows of the interp matmul, padded to a full sublane tile
T_PAD = 8        # T_DATA = 7 data symbols, padded to a full sublane tile


# ------------------------- fused Pallas kernel -------------------------------
# 1) LMMSE frequency interpolation as ONE real-block MXU matmul:
#       [h_re | h_im] @ [[Wt_re, Wt_im], [-Wt_im, Wt_re]] = [hhat_re | hhat_im]
# 2) conj(h) * y combining over rx antennas (static unroll over B, R)
# 3) QPSK max-log LLR scaling + hard decision, single lane-dense bit output.
def _rx_kernel(scale_ref, hls_ref, w_ref, yr_ref, yi_ref, bits_ref):
    # ---- channel interpolation: [8,128] @ [128,256] -> [8,256] on the MXU ---
    h = jnp.dot(hls_ref[...], w_ref[...], preferred_element_type=jnp.float32)
    hr = h[:, :F]          # [M_PAD, F]  real(h_hat), row m = b*R + r
    hi = h[:, F:]          # [M_PAD, F]  imag(h_hat)

    scale = scale_ref[0]   # 2*sqrt(2) / no, reciprocal precomputed in wrapper

    for b in range(B):                       # tiny static unroll (B*R = 4)
        num_re = jnp.zeros((T_PAD, F), jnp.float32)
        num_im = jnp.zeros((T_PAD, F), jnp.float32)
        for r in range(R):
            m = b * R + r
            hr_m = hr[m:m + 1, :]            # [1, F] sublane-broadcast row
            hi_m = hi[m:m + 1, :]
            y_r = yr_ref[b, r]               # [T_PAD, F]
            y_i = yi_ref[b, r]
            # conj(h) * y, summed over rx antennas (MRC combining)
            num_re = num_re + hr_m * y_r + hi_m * y_i
            num_im = num_im + hr_m * y_i - hi_m * y_r

        # Max-log QPSK LLRs (Gray mapping: bit0 <- real, bit1 <- imag).
        # For single-stream MRC/LMMSE the equalization denominator
        # (sum_r |h|^2 + no) cancels exactly in the max-log LLR, leaving only
        # the 2*sqrt(2)/no scale, which is positive -> hard decisions exact.
        # TODO(synk): fold per-RE channel-estimation error variance into the
        # effective noise and flip to Sionna's log P(b=1)/P(b=0) convention if
        # soft LLRs ever feed an LDPC decoder.
        l0 = scale * num_re
        l1 = scale * num_im
        b0 = jnp.where(l0 < 0.0, 1.0, 0.0).astype(jnp.float32)
        b1 = jnp.where(l1 < 0.0, 1.0, 0.0).astype(jnp.float32)
        bits_ref[b] = jnp.concatenate([b0, b1], axis=-1)   # [T_PAD, 2F]


def _rx_pallas(scale, hls_blk, w_blk, y_re, y_im):
    full = lambda s: pl.BlockSpec(s, lambda i, _s=s: (0,) * len(_s))
    return pl.pallas_call(
        _rx_kernel,
        grid=(1,),
        in_specs=[pl.BlockSpec(memory_space=pltpu.MemorySpace.SMEM),
                  full((M_PAD, 2 * P)),
                  full((2 * P, 2 * F)),
                  full((B, R, T_PAD, F)),
                  full((B, R, T_PAD, F))],
        out_specs=full((B, T_PAD, 2 * F)),
        out_shape=jax.ShapeDtypeStruct((B, T_PAD, 2 * F), jnp.float32),
        compiler_params=pltpu.CompilerParams(
            dimension_semantics=("arbitrary",)),
    )(scale, hls_blk, w_blk, y_re, y_im)


# ------------------------- deterministic "parameters" -----------------------
def make_params(no):
    """Setup-time parameters, incl. the hoisted LMMSE interpolation matrix."""
    # QPSK DMRS pilots (deterministic, unit modulus)
    k = jnp.arange(P, dtype=jnp.float32)
    phase = (jnp.pi / 4.0) * (2.0 * jnp.mod(k, 4.0) + 1.0)
    pilots = (jnp.cos(phase) + 1j * jnp.sin(phase)).astype(jnp.complex64)

    # Frequency covariance matrix (exponential correlation with a phase ramp)
    idx = jnp.arange(F, dtype=jnp.float32)
    d = idx[:, None] - idx[None, :]
    cov_freq = (jnp.exp(-jnp.abs(d) / 16.0) *
                (jnp.cos(0.05 * d) + 1j * jnp.sin(0.05 * d))).astype(jnp.complex64)

    pilot_sc = jnp.arange(0, F, 2, dtype=jnp.int32)

    # LMMSE interpolation matrix W = R_fp (R_pp + err_ls I)^-1, solved ONCE at
    # setup (hoisted out of the per-call path).  Complex solve done as a real
    # 2Px2P block system.
    R_fp = cov_freq[:, pilot_sc]                                  # [F, P]
    R_pp = cov_freq[pilot_sc][:, pilot_sc]                        # [P, P]
    err_ls = jnp.asarray(no, jnp.float32) / jnp.mean(jnp.abs(pilots) ** 2)
    A = R_pp + err_ls * jnp.eye(P, dtype=jnp.complex64)
    At = A.T
    M2 = jnp.block([[At.real, -At.imag], [At.imag, At.real]])     # [2P, 2P]
    C = jnp.concatenate([R_fp.T.real, R_fp.T.imag], axis=0)       # [2P, F]
    X = jnp.linalg.solve(M2, C)
    W = (X[:P] + 1j * X[P:]).T.astype(jnp.complex64)              # [F, P]

    # Stacked real-block RHS for the single in-kernel MXU matmul:
    #   [h_re | h_im] @ [[Wt_re, Wt_im], [-Wt_im, Wt_re]] = [hhat_re | hhat_im]
    Wt = W.T                                                      # [P, F]
    wt_re = Wt.real.astype(jnp.float32)
    wt_im = Wt.imag.astype(jnp.float32)
    w_blk = jnp.block([[wt_re, wt_im], [-wt_im, wt_re]])          # [2P, 2F]

    return {"pilots": pilots, "w_blk": w_blk}


# ------------------------- receiver forward (glue + fused kernel) -----------
@jax.jit
def baseline_receiver_forward(y, no, params):
    """y: [B, F, T, R] complex64, no: float32 scalar -> b_hat [B, NUM_TX, TB_SIZE]."""
    pilots = params["pilots"]
    w_blk = params["w_blk"]

    # ---- LS estimation at pilot REs (comb-2 strided slice + divide) --------
    y_pilots = y[:, ::2, PILOT_SYM, :]                            # [B, P, R]
    h_ls = y_pilots / pilots[None, :, None]                       # [B, P, R]
    h_ls = jnp.transpose(h_ls, (0, 2, 1)).reshape(B * R, P)       # rows = b*R + r

    # real-block LHS for the interp matmul, zero-padded to 8 sublane rows
    hls_blk = jnp.zeros((M_PAD, 2 * P), jnp.float32)
    hls_blk = hls_blk.at[:B * R, :P].set(h_ls.real.astype(jnp.float32))
    hls_blk = hls_blk.at[:B * R, P:].set(h_ls.imag.astype(jnp.float32))

    # ---- data REs: [B, R, T_PAD, F], padded over OFDM symbols --------------
    y_data = jnp.concatenate([y[:, :, :PILOT_SYM, :],
                              y[:, :, PILOT_SYM + 1:, :]], axis=2)  # [B, F, Td, R]
    y_data = jnp.transpose(y_data, (0, 3, 2, 1))                    # [B, R, Td, F]
    y_data = jnp.pad(y_data, ((0, 0), (0, 0), (0, T_PAD - T_DATA), (0, 0)))
    y_re = y_data.real.astype(jnp.float32)
    y_im = y_data.imag.astype(jnp.float32)

    # LLR scale with the reciprocal taken in the wrapper (single scalar op)
    scale = jnp.reshape(2.0 * jnp.sqrt(2.0) /
                        jnp.asarray(no, jnp.float32), (1,))

    # ---- fused Pallas kernel: interp matmul + MRC combine + hard bits ------
    bits = _rx_pallas(scale, hls_blk, w_blk, y_re, y_im)           # [B, T_PAD, 2F]

    # TODO(synk): LDPC / transport-block decoding and CRC are not implemented;
    # the in-kernel hard decisions stand in for the decoder output.
    bits = bits[:, :T_DATA].reshape(B, T_DATA, BITS_PER_SYM, F)
    bits = jnp.transpose(bits, (0, 1, 3, 2))                       # [B, Td, F, 2]
    return bits.reshape(B, NUM_TX, TB_SIZE)


# ------------------------- main ---------------------------------------------
if __name__ == "__main__":
    key = jax.random.PRNGKey(0)
    k1, k2 = jax.random.split(key)
    y = ((jax.random.normal(k1, (B, F, T, R)) +
          1j * jax.random.normal(k2, (B, F, T, R))) /
         jnp.sqrt(2.0)).astype(jnp.complex64)
    no = jnp.float32(0.01)

    params = make_params(no)
    b_hat = baseline_receiver_forward(y, no, params)
    b_hat = jax.block_until_ready(b_hat)

    assert b_hat.shape == (B, NUM_TX, TB_SIZE), b_hat.shape
    assert b_hat.dtype == jnp.float32
    print("KERNEL_OK")
</pallas_src>

<mosaic_0001>
module attributes {stable_mosaic.version = 11 : i64} {
  func.func @_rx_kernel(%arg0: i32, %arg1: memref<1xf32, #tpu.memory_space<smem>>, %arg2: memref<8x128xf32, #tpu.memory_space<vmem>>, %arg3: memref<128x256xf32, #tpu.memory_space<vmem>>, %arg4: memref<2x2x8x128xf32, #tpu.memory_space<vmem>>, %arg5: memref<2x2x8x128xf32, #tpu.memory_space<vmem>>, %arg6: memref<2x8x256xf32, #tpu.memory_space<vmem>>) attributes {dimension_semantics = [#tpu.dimension_semantics<arbitrary>], iteration_bounds = array<i64: 1>, scalar_prefetch = 0 : i64, scratch_operands = 0 : i64, tpu.core_type = #tpu.core_type<tc>, window_params = [{transform_indices = @transform_0, window_bounds = array<i64: 1>}, {pipeline_mode = #tpu.pipeline_mode<synchronous>, transform_indices = @transform_1, window_bounds = array<i64: 8, 128>}, {pipeline_mode = #tpu.pipeline_mode<synchronous>, transform_indices = @transform_2, window_bounds = array<i64: 128, 256>}, {pipeline_mode = #tpu.pipeline_mode<synchronous>, transform_indices = @transform_3, window_bounds = array<i64: 2, 2, 8, 128>}, {pipeline_mode = #tpu.pipeline_mode<synchronous>, transform_indices = @transform_4, window_bounds = array<i64: 2, 2, 8, 128>}, {pipeline_mode = #tpu.pipeline_mode<synchronous>, transform_indices = @transform_5, window_bounds = array<i64: 2, 8, 256>}]} {
    %c0 = arith.constant 0 : index
    %c0_0 = arith.constant 0 : index
    %0 = vector.load %arg2[%c0, %c0_0] : memref<8x128xf32, #tpu.memory_space<vmem>>, vector<8x128xf32>
    %c0_1 = arith.constant 0 : index
    %c0_2 = arith.constant 0 : index
    %1 = vector.load %arg3[%c0_1, %c0_2] : memref<128x256xf32, #tpu.memory_space<vmem>>, vector<128x256xf32>
    %cst = arith.constant dense<0.000000e+00> : vector<8x256xf32>
    %2 = tpu.matmul %0, %1, %cst {dimension_numbers = #tpu.dot_dimension_numbers<[1], [0], [0], [1], [0, 0, 1, 1], [], []>} : vector<8x128xf32>, vector<128x256xf32>, vector<8x256xf32> -> vector<8x256xf32>
    %3 = vector.extract_strided_slice %2 {offsets = [0, 0], sizes = [8, 128], strides = [1, 1]} : vector<8x256xf32> to vector<8x128xf32>
    %4 = vector.extract_strided_slice %2 {offsets = [0, 128], sizes = [8, 128], strides = [1, 1]} : vector<8x256xf32> to vector<8x128xf32>
    %c0_3 = arith.constant 0 : index
    %5 = memref.load %arg1[%c0_3] : memref<1xf32, #tpu.memory_space<smem>>
    %cst_4 = arith.constant 0.000000e+00 : f32
    %6 = vector.broadcast %cst_4 : f32 to vector<8x128xf32>
    %cst_5 = arith.constant 0.000000e+00 : f32
    %7 = vector.broadcast %cst_5 : f32 to vector<8x128xf32>
    %8 = vector.extract_strided_slice %3 {offsets = [0, 0], sizes = [1, 128], strides = [1, 1]} : vector<8x128xf32> to vector<1x128xf32>
    %9 = vector.extract_strided_slice %4 {offsets = [0, 0], sizes = [1, 128], strides = [1, 1]} : vector<8x128xf32> to vector<1x128xf32>
    %c0_6 = arith.constant 0 : index
    %c0_7 = arith.constant 0 : index
    %c0_8 = arith.constant 0 : index
    %c0_9 = arith.constant 0 : index
    %10 = vector.load %arg4[%c0_6, %c0_7, %c0_8, %c0_9] : memref<2x2x8x128xf32, #tpu.memory_space<vmem>>, vector<1x1x8x128xf32>
    %11 = vector.shape_cast %10 : vector<1x1x8x128xf32> to vector<8x128xf32>
    %c0_10 = arith.constant 0 : index
    %c0_11 = arith.constant 0 : index
    %c0_12 = arith.constant 0 : index
    %c0_13 = arith.constant 0 : index
    %12 = vector.load %arg5[%c0_10, %c0_11, %c0_12, %c0_13] : memref<2x2x8x128xf32, #tpu.memory_space<vmem>>, vector<1x1x8x128xf32>
    %13 = vector.shape_cast %12 : vector<1x1x8x128xf32> to vector<8x128xf32>
    %14 = vector.broadcast %8 : vector<1x128xf32> to vector<8x128xf32>
    %15 = arith.mulf %14, %11 : vector<8x128xf32>
    %16 = arith.addf %6, %15 : vector<8x128xf32>
    %17 = vector.broadcast %9 : vector<1x128xf32> to vector<8x128xf32>
    %18 = arith.mulf %17, %13 : vector<8x128xf32>
    %19 = arith.addf %16, %18 : vector<8x128xf32>
    %20 = vector.broadcast %8 : vector<1x128xf32> to vector<8x128xf32>
    %21 = arith.mulf %20, %13 : vector<8x128xf32>
    %22 = arith.addf %7, %21 : vector<8x128xf32>
    %23 = vector.broadcast %9 : vector<1x128xf32> to vector<8x128xf32>
    %24 = arith.mulf %23, %11 : vector<8x128xf32>
    %25 = arith.subf %22, %24 : vector<8x128xf32>
    %26 = vector.extract_strided_slice %3 {offsets = [1, 0], sizes = [1, 128], strides = [1, 1]} : vector<8x128xf32> to vector<1x128xf32>
    %27 = vector.extract_strided_slice %4 {offsets = [1, 0], sizes = [1, 128], strides = [1, 1]} : vector<8x128xf32> to vector<1x128xf32>
    %c0_14 = arith.constant 0 : index
    %c1 = arith.constant 1 : index
    %c0_15 = arith.constant 0 : index
    %c0_16 = arith.constant 0 : index
    %28 = vector.load %arg4[%c0_14, %c1, %c0_15, %c0_16] : memref<2x2x8x128xf32, #tpu.memory_space<vmem>>, vector<1x1x8x128xf32>
    %29 = vector.shape_cast %28 : vector<1x1x8x128xf32> to vector<8x128xf32>
    %c0_17 = arith.constant 0 : index
    %c1_18 = arith.constant 1 : index
    %c0_19 = arith.constant 0 : index
    %c0_20 = arith.constant 0 : index
    %30 = vector.load %arg5[%c0_17, %c1_18, %c0_19, %c0_20] : memref<2x2x8x128xf32, #tpu.memory_space<vmem>>, vector<1x1x8x128xf32>
    %31 = vector.shape_cast %30 : vector<1x1x8x128xf32> to vector<8x128xf32>
    %32 = vector.broadcast %26 : vector<1x128xf32> to vector<8x128xf32>
    %33 = arith.mulf %32, %29 : vector<8x128xf32>
    %34 = arith.addf %19, %33 : vector<8x128xf32>
    %35 = vector.broadcast %27 : vector<1x128xf32> to vector<8x128xf32>
    %36 = arith.mulf %35, %31 : vector<8x128xf32>
    %37 = arith.addf %34, %36 : vector<8x128xf32>
    %38 = vector.broadcast %26 : vector<1x128xf32> to vector<8x128xf32>
    %39 = arith.mulf %38, %31 : vector<8x128xf32>
    %40 = arith.addf %25, %39 : vector<8x128xf32>
    %41 = vector.broadcast %27 : vector<1x128xf32> to vector<8x128xf32>
    %42 = arith.mulf %41, %29 : vector<8x128xf32>
    %43 = arith.subf %40, %42 : vector<8x128xf32>
    %44 = vector.broadcast %5 : f32 to vector<8x128xf32>
    %45 = arith.mulf %44, %37 : vector<8x128xf32>
    %46 = vector.broadcast %5 : f32 to vector<8x128xf32>
    %47 = arith.mulf %46, %43 : vector<8x128xf32>
    %cst_21 = arith.constant 0.000000e+00 : f32
    %48 = vector.broadcast %cst_21 : f32 to vector<8x128xf32>
    %49 = arith.cmpf olt, %45, %48 : vector<8x128xf32>
    %cst_22 = arith.constant 1.000000e+00 : f32
    %cst_23 = arith.constant 0.000000e+00 : f32
    %50 = vector.broadcast %cst_22 : f32 to vector<8x128xf32>
    %51 = vector.broadcast %cst_23 : f32 to vector<8x128xf32>
    %52 = arith.select %49, %50, %51 : vector<8x128xi1>, vector<8x128xf32>
    %cst_24 = arith.constant 0.000000e+00 : f32
    %53 = vector.broadcast %cst_24 : f32 to vector<8x128xf32>
    %54 = arith.cmpf olt, %47, %53 : vector<8x128xf32>
    %cst_25 = arith.constant 1.000000e+00 : f32
    %cst_26 = arith.constant 0.000000e+00 : f32
    %55 = vector.broadcast %cst_25 : f32 to vector<8x128xf32>
    %56 = vector.broadcast %cst_26 : f32 to vector<8x128xf32>
    %57 = arith.select %54, %55, %56 : vector<8x128xi1>, vector<8x128xf32>
    %58 = tpu.concatenate %52, %57 in 1 : vector<8x128xf32>, vector<8x128xf32> -> vector<8x256xf32>
    %c0_27 = arith.constant 0 : index
    %c0_28 = arith.constant 0 : index
    %c0_29 = arith.constant 0 : index
    %59 = vector.load %arg6[%c0_27, %c0_28, %c0_29] : memref<2x8x256xf32, #tpu.memory_space<vmem>>, vector<1x8x256xf32>
    %60 = vector.shape_cast %59 : vector<1x8x256xf32> to vector<8x256xf32>
    %61 = vector.shape_cast %58 : vector<8x256xf32> to vector<1x8x256xf32>
    tpu.vector_store %arg6[%c0_27, %c0_28, %c0_29], %61 {strides = array<i32>} : memref<2x8x256xf32, #tpu.memory_space<vmem>>, vector<1x8x256xf32>,
    %cst_30 = arith.constant 0.000000e+00 : f32
    %62 = vector.broadcast %cst_30 : f32 to vector<8x128xf32>
    %cst_31 = arith.constant 0.000000e+00 : f32
    %63 = vector.broadcast %cst_31 : f32 to vector<8x128xf32>
    %64 = vector.extract_strided_slice %3 {offsets = [2, 0], sizes = [1, 128], strides = [1, 1]} : vector<8x128xf32> to vector<1x128xf32>
    %65 = vector.extract_strided_slice %4 {offsets = [2, 0], sizes = [1, 128], strides = [1, 1]} : vector<8x128xf32> to vector<1x128xf32>
    %c1_32 = arith.constant 1 : index
    %c0_33 = arith.constant 0 : index
    %c0_34 = arith.constant 0 : index
    %c0_35 = arith.constant 0 : index
    %66 = vector.load %arg4[%c1_32, %c0_33, %c0_34, %c0_35] : memref<2x2x8x128xf32, #tpu.memory_space<vmem>>, vector<1x1x8x128xf32>
    %67 = vector.shape_cast %66 : vector<1x1x8x128xf32> to vector<8x128xf32>
    %c1_36 = arith.constant 1 : index
    %c0_37 = arith.constant 0 : index
    %c0_38 = arith.constant 0 : index
    %c0_39 = arith.constant 0 : index
    %68 = vector.load %arg5[%c1_36, %c0_37, %c0_38, %c0_39] : memref<2x2x8x128xf32, #tpu.memory_space<vmem>>, vector<1x1x8x128xf32>
    %69 = vector.shape_cast %68 : vector<1x1x8x128xf32> to vector<8x128xf32>
    %70 = vector.broadcast %64 : vector<1x128xf32> to vector<8x128xf32>
    %71 = arith.mulf %70, %67 : vector<8x128xf32>
    %72 = arith.addf %62, %71 : vector<8x128xf32>
    %73 = vector.broadcast %65 : vector<1x128xf32> to vector<8x128xf32>
    %74 = arith.mulf %73, %69 : vector<8x128xf32>
    %75 = arith.addf %72, %74 : vector<8x128xf32>
    %76 = vector.broadcast %64 : vector<1x128xf32> to vector<8x128xf32>
    %77 = arith.mulf %76, %69 : vector<8x128xf32>
    %78 = arith.addf %63, %77 : vector<8x128xf32>
    %79 = vector.broadcast %65 : vector<1x128xf32> to vector<8x128xf32>
    %80 = arith.mulf %79, %67 : vector<8x128xf32>
    %81 = arith.subf %78, %80 : vector<8x128xf32>
    %82 = vector.extract_strided_slice %3 {offsets = [3, 0], sizes = [1, 128], strides = [1, 1]} : vector<8x128xf32> to vector<1x128xf32>
    %83 = vector.extract_strided_slice %4 {offsets = [3, 0], sizes = [1, 128], strides = [1, 1]} : vector<8x128xf32> to vector<1x128xf32>
    %c1_40 = arith.constant 1 : index
    %c1_41 = arith.constant 1 : index
    %c0_42 = arith.constant 0 : index
    %c0_43 = arith.constant 0 : index
    %84 = vector.load %arg4[%c1_40, %c1_41, %c0_42, %c0_43] : memref<2x2x8x128xf32, #tpu.memory_space<vmem>>, vector<1x1x8x128xf32>
    %85 = vector.shape_cast %84 : vector<1x1x8x128xf32> to vector<8x128xf32>
    %c1_44 = arith.constant 1 : index
    %c1_45 = arith.constant 1 : index
    %c0_46 = arith.constant 0 : index
    %c0_47 = arith.constant 0 : index
    %86 = vector.load %arg5[%c1_44, %c1_45, %c0_46, %c0_47] : memref<2x2x8x128xf32, #tpu.memory_space<vmem>>, vector<1x1x8x128xf32>
    %87 = vector.shape_cast %86 : vector<1x1x8x128xf32> to vector<8x128xf32>
    %88 = vector.broadcast %82 : vector<1x128xf32> to vector<8x128xf32>
    %89 = arith.mulf %88, %85 : vector<8x128xf32>
    %90 = arith.addf %75, %89 : vector<8x128xf32>
    %91 = vector.broadcast %83 : vector<1x128xf32> to vector<8x128xf32>
    %92 = arith.mulf %91, %87 : vector<8x128xf32>
    %93 = arith.addf %90, %92 : vector<8x128xf32>
    %94 = vector.broadcast %82 : vector<1x128xf32> to vector<8x128xf32>
    %95 = arith.mulf %94, %87 : vector<8x128xf32>
    %96 = arith.addf %81, %95 : vector<8x128xf32>
    %97 = vector.broadcast %83 : vector<1x128xf32> to vector<8x128xf32>
    %98 = arith.mulf %97, %85 : vector<8x128xf32>
    %99 = arith.subf %96, %98 : vector<8x128xf32>
    %100 = vector.broadcast %5 : f32 to vector<8x128xf32>
    %101 = arith.mulf %100, %93 : vector<8x128xf32>
    %102 = vector.broadcast %5 : f32 to vector<8x128xf32>
    %103 = arith.mulf %102, %99 : vector<8x128xf32>
    %cst_48 = arith.constant 0.000000e+00 : f32
    %104 = vector.broadcast %cst_48 : f32 to vector<8x128xf32>
    %105 = arith.cmpf olt, %101, %104 : vector<8x128xf32>
    %cst_49 = arith.constant 1.000000e+00 : f32
    %cst_50 = arith.constant 0.000000e+00 : f32
    %106 = vector.broadcast %cst_49 : f32 to vector<8x128xf32>
    %107 = vector.broadcast %cst_50 : f32 to vector<8x128xf32>
    %108 = arith.select %105, %106, %107 : vector<8x128xi1>, vector<8x128xf32>
    %cst_51 = arith.constant 0.000000e+00 : f32
    %109 = vector.broadcast %cst_51 : f32 to vector<8x128xf32>
    %110 = arith.cmpf olt, %103, %109 : vector<8x128xf32>
    %cst_52 = arith.constant 1.000000e+00 : f32
    %cst_53 = arith.constant 0.000000e+00 : f32
    %111 = vector.broadcast %cst_52 : f32 to vector<8x128xf32>
    %112 = vector.broadcast %cst_53 : f32 to vector<8x128xf32>
    %113 = arith.select %110, %111, %112 : vector<8x128xi1>, vector<8x128xf32>
    %114 = tpu.concatenate %108, %113 in 1 : vector<8x128xf32>, vector<8x128xf32> -> vector<8x256xf32>
    %c1_54 = arith.constant 1 : index
    %c0_55 = arith.constant 0 : index
    %c0_56 = arith.constant 0 : index
    %115 = vector.load %arg6[%c1_54, %c0_55, %c0_56] : memref<2x8x256xf32, #tpu.memory_space<vmem>>, vector<1x8x256xf32>
    %116 = vector.shape_cast %115 : vector<1x8x256xf32> to vector<8x256xf32>
    %117 = vector.shape_cast %114 : vector<8x256xf32> to vector<1x8x256xf32>
    tpu.vector_store %arg6[%c1_54, %c0_55, %c0_56], %117 {strides = array<i32>} : memref<2x8x256xf32, #tpu.memory_space<vmem>>, vector<1x8x256xf32>,
    return
  }
  func.func @transform_0(%arg0: i32) -> i32 {
    %c0_i32 = arith.constant 0 : i32
    %c0_i32_0 = arith.constant 0 : i32
    return %c0_i32 : i32
  }
  func.func @transform_1(%arg0: i32) -> (i32, i32) {
    %c0_i32 = arith.constant 0 : i32
    %c0_i32_0 = arith.constant 0 : i32
    %c0_i32_1 = arith.constant 0 : i32
    return %c0_i32, %c0_i32_0 : i32, i32
  }
  func.func @transform_2(%arg0: i32) -> (i32, i32) {
    %c0_i32 = arith.constant 0 : i32
    %c0_i32_0 = arith.constant 0 : i32
    %c0_i32_1 = arith.constant 0 : i32
    return %c0_i32, %c0_i32_0 : i32, i32
  }
  func.func @transform_3(%arg0: i32) -> (i32, i32, i32, i32) {
    %c0_i32 = arith.constant 0 : i32
    %c0_i32_0 = arith.constant 0 : i32
    %c0_i32_1 = arith.constant 0 : i32
    %c0_i32_2 = arith.constant 0 : i32
    %c0_i32_3 = arith.constant 0 : i32
    return %c0_i32, %c0_i32_0, %c0_i32_1, %c0_i32_2 : i32, i32, i32, i32
  }
  func.func @transform_4(%arg0: i32) -> (i32, i32, i32, i32) {
    %c0_i32 = arith.constant 0 : i32
    %c0_i32_0 = arith.constant 0 : i32
    %c0_i32_1 = arith.constant 0 : i32
    %c0_i32_2 = arith.constant 0 : i32
    %c0_i32_3 = arith.constant 0 : i32
    return %c0_i32, %c0_i32_0, %c0_i32_1, %c0_i32_2 : i32, i32, i32, i32
  }
  func.func @transform_5(%arg0: i32) -> (i32, i32, i32) {
    %c0_i32 = arith.constant 0 : i32
    %c0_i32_0 = arith.constant 0 : i32
    %c0_i32_1 = arith.constant 0 : i32
    %c0_i32_2 = arith.constant 0 : i32
    return %c0_i32, %c0_i32_0, %c0_i32_1 : i32, i32, i32
  }
}

</mosaic_0001>

<bundles_post_ra>
// kernel: custom-call.3
= control target key start
LH: loop header
LB: loop body
LE: loop exit
PB: predicated region body
PF: predicated region fallthrough
CT: control target
= control target key end

     0   :  { %s59_s0 = inlined_call_operand.hbm [shape: c64[64], index: 0, kind: input, shape index: {}]   ;;  %s60_s1 = inlined_call_operand.vmem [shape: f32[64], index: 1, kind: output, shape index: {}]  }
   0x1   :  { %s2_s8 = scalar_lea.hbm %s59_s0, 16 }
   0x2   :  { %3 = vsyncpa [#allocation0], 0  ;;  %s4_s11 = sshll.u32 %s60_s1, 4  ;;  %s34_s14 = scalar_lea.hbm %s59_s0, 32  ;;  %s5_s11 = int_to_ptr.vmem [resolvable:$true] %s4_s11 }
   0x3   :  { %p11_p0 = scmp.ne.s32.totalorder %s2_s8, %s34_s14  ;;  %p13_p1 = scmp.lt.u32.totalorder %s2_s8, %s59_s0 }
   0x4   :  { %p14_p2 = scmp.lt.u32.totalorder %s34_s14, %s34_s14  ;;  %p16_p4 = scmp.lt.u32.totalorder %s34_s14, %s2_s8 }
   0x6   :  { %p15_p3 = por %p14_p2, %p13_p1 }
   0x8   :  { %p17_p5 = por %p16_p4, %p15_p3 }
   0xa   :  { %p18_p6 = pnand %p17_p5, %p11_p0 }
   0xc   :  { %21 = shalt.err (!%p18_p6)  }
   0xd   :  { %s22_s17 = scalar_lea.vmem %s5_s11, 16  ;;  %p27_p8 = scmp.lt.s32.totalorder %s5_s11, %s5_s11 }
   0xe   :  { %p23_p7 = scmp.ne.s32.totalorder %s5_s11, %s22_s17  ;;  %p28_p9 = scmp.lt.s32.totalorder %s22_s17, %s22_s17 }
  0x10   :  { %p29_p10 = por %p28_p9, %p27_p8 }
  0x12   :  { %p30_p11 = pnand %p29_p10, %p23_p7 }
  0x14   :  { %33 = shalt.err (!%p30_p11)  }
  0x15   :  { %7 = dma.hbm_to_vmem [thread:$0]  %s2_s8, 16, %s5_s11, [#allocation0] }
  0x16   :  { %35 = dma.done.wait [#allocation0], 16  }
  0x17   :  { %36 = vsyncadd [#allocation0], 4294967280 }
  0x18   :  { %9 = vsyncpa [#allocation0], 1 }

// kernel: custom-call.2
= control target key start
LH: loop header
LB: loop body
LE: loop exit
PB: predicated region body
PF: predicated region fallthrough
CT: control target
= control target key end

     0   :  { %2 = vsyncpa [#allocation0], 0  ;;  %s61_s0 = inlined_call_operand.hbm [shape: c64[64], index: 0, kind: input, shape index: {}]   ;;  %s62_s1 = inlined_call_operand.vmem [shape: f32[64], index: 1, kind: output, shape index: {}]  }
   0x1   :  { %s3_s8 = sshll.u32 %s62_s1, 4  ;;  %s9_s11 = scalar_lea.hbm %s61_s0, 16  ;;  %s4_s8 = int_to_ptr.vmem [resolvable:$true] %s3_s8 }
   0x2   :  { %p10_p0 = scmp.ne.s32.totalorder %s61_s0, %s9_s11  ;;  %s11_s16 = scalar_lea.hbm %s61_s0, 32 }
   0x3   :  { %p12_p1 = scmp.lt.u32.totalorder %s11_s16, %s9_s11  ;;  %p13_p2 = scmp.lt.u32.totalorder %s9_s11, %s61_s0 }
   0x5   :  { %p14_p3 = por %p13_p2, %p12_p1 }
   0x7   :  { %p15_p4 = pnand %p14_p3, %p10_p0 }
   0x9   :  { %18 = shalt.err (!%p15_p4)  }
   0xa   :  { %s19_s1 = scalar_lea.vmem %s4_s8, 16  ;;  %p24_p6 = scmp.lt.s32.totalorder %s4_s8, %s4_s8 }
   0xb   :  { %p20_p5 = scmp.ne.s32.totalorder %s4_s8, %s19_s1  ;;  %p25_p7 = scmp.lt.s32.totalorder %s19_s1, %s19_s1 }
   0xd   :  { %p26_p8 = por %p25_p7, %p24_p6 }
   0xf   :  { %p27_p9 = pnand %p26_p8, %p20_p5 }
  0x11   :  { %30 = shalt.err (!%p27_p9)  }
  0x12   :  { %6 = dma.hbm_to_vmem [thread:$0]  %s61_s0, 16, %s4_s8, [#allocation0] }
  0x13   :  { %31 = dma.done.wait [#allocation0], 16  }
  0x14   :  { %32 = vsyncadd [#allocation0], 4294967280 }
  0x15   :  { %8 = vsyncpa [#allocation0], 1 }

// kernel: custom-call.1
= control target key start
LH: loop header
LB: loop body
LE: loop exit
PB: predicated region body
PF: predicated region fallthrough
CT: control target
= control target key end

     0   :  { %s61_s0 = inlined_call_operand.vmem [shape: c64[2,128,8,2], index: 0, kind: input, shape index: {}]   ;;  %s62_s1 = inlined_call_operand.vmem [shape: f32[2,128,8,2], index: 1, kind: output, shape index: {}]  }
   0x1   :  { %v20_v0 = vld [vmem:[%s61_s0 + $0x20] sm:$0xff]  ;;  %v21_v1 = vld [vmem:[%s61_s0 + $0x28] sm:$0xff]  ;;  %v23_v2 = vld [vmem:[%s61_s0 + $0x30] sm:$0xff] }
   0x2   :  { %4 = vst [vmem:[%s62_s1] sm:$0xff] %v20_v0  ;;  %22 = vst [vmem:[%s62_s1 + $0x8] sm:$0xff] %v21_v1  ;;  %v25_v3 = vld [vmem:[%s61_s0 + $0x38] sm:$0xff] }
   0x3   :  { %24 = vst [vmem:[%s62_s1 + $0x10] sm:$0xff] %v23_v2  ;;  %26 = vst [vmem:[%s62_s1 + $0x18] sm:$0xff] %v25_v3 }

// kernel: custom-call
= control target key start
LH: loop header
LB: loop body
LE: loop exit
PB: predicated region body
PF: predicated region fallthrough
CT: control target
= control target key end

     0   :  { %s56_s0 = inlined_call_operand.vmem [shape: c64[2,128,8,2], index: 0, kind: input, shape index: {}]   ;;  %s57_s1 = inlined_call_operand.vmem [shape: f32[2,128,8,2], index: 1, kind: output, shape index: {}]  }
   0x1   :  { %v2_v0 = vld [vmem:[%s56_s0] sm:$0xff]  ;;  %v16_v1 = vld [vmem:[%s56_s0 + $0x8] sm:$0xff]  ;;  %v18_v2 = vld [vmem:[%s56_s0 + $0x10] sm:$0xff] }
   0x2   :  { %3 = vst [vmem:[%s57_s1] sm:$0xff] %v2_v0  ;;  %17 = vst [vmem:[%s57_s1 + $0x8] sm:$0xff] %v16_v1  ;;  %v20_v3 = vld [vmem:[%s56_s0 + $0x18] sm:$0xff] }
   0x3   :  { %19 = vst [vmem:[%s57_s1 + $0x10] sm:$0xff] %v18_v2  ;;  %21 = vst [vmem:[%s57_s1 + $0x18] sm:$0xff] %v20_v3 }

// kernel: baseline_receiver_forward.1
= control target key start
LH: loop header
LB: loop body
LE: loop exit
PB: predicated region body
PF: predicated region fallthrough
CT: control target
= control target key end

     0   :  { %v267_v3 = vmov 0.0   ;;  %v128_v50 = vlaneseq  ;;  %s441_s2 = inlined_call_operand.vmem [shape: f32[128,256], index: 2, kind: input, shape index: {}]   ;;  %s442_s1 = inlined_call_operand.vmem [shape: f32[8,128], index: 1, kind: input, shape index: {}]   ;;  %s443_s3 = inlined_call_operand.vmem [shape: f32[2,2,8,128], index: 3, kind: input, shape index: {}]   ;;  %s444_s4 = inlined_call_operand.vmem [shape: f32[2,2,8,128], index: 4, kind: input, shape index: {}]   ;;  %s445_s0 = inlined_call_operand.<no memory space> [shape: f32[1], index: 0, kind: input, shape index: {}]   ;;  %s446_s5 = inlined_call_operand.vmem [shape: f32[2,8,256], index: 5, kind: output, shape index: {}]  }
   0x1   :  { %v23_v0 = vld [vmem:[%s441_s2 + $0x8] sm:$0xff]  ;;  %v25_v1 = vld [vmem:[%s441_s2 + $0x18] sm:$0xff]  ;;  %v22_v2 = vld [vmem:[%s441_s2] sm:$0xff]  ;;  %118 = vmatprep.mubr.f32.mxu0 %v267_v3 }
   0x2   :  { %v234_v4 = vpack.c.bf16 %v25_v1, %v23_v0  ;;  %v24_v5 = vld [vmem:[%s441_s2 + $0x10] sm:$0xff]  ;;  %v27_v6 = vld [vmem:[%s441_s2 + $0x28] sm:$0xff]  ;;  %v29_v7 = vld [vmem:[%s441_s2 + $0x38] sm:$0xff]  ;;  %v129_v51 = vshrl.u32 %v128_v50, 7 }
   0x3   :  { %v236_v8 = vpack.c.bf16 %v24_v5, %v22_v2  ;;  %v238_v9 = vpack.c.bf16 %v29_v7, %v27_v6  ;;  %v26_v10 = vld [vmem:[%s441_s2 + $0x20] sm:$0xff]  ;;  %v28_v11 = vld [vmem:[%s441_s2 + $0x30] sm:$0xff]  ;;  %v31_v12 = vld [vmem:[%s441_s2 + $0x48] sm:$0xff] }
   0x4   :  { %235 = vmatprep.subr.bf16.mxu0 %v234_v4  ;;  %v33_v13 = vld [vmem:[%s441_s2 + $0x58] sm:$0xff]  ;;  %v240_v14 = vpack.c.bf16 %v28_v11, %v26_v10  ;;  %v30_v16 = vld [vmem:[%s441_s2 + $0x40] sm:$0xff]  ;;  %v32_v17 = vld [vmem:[%s441_s2 + $0x50] sm:$0xff]  ;;  %v130_v52 = vsub.s32 0, %v129_v51  ;;  %v179_v53 = vsub.s32 2, %v129_v51  ;;  %v150_v54 = vsub.s32 1, %v129_v51 }
   0x5   :  { %237 = vmatpush1.bf16.msra.mxu0 %v236_v8  ;;  %v242_v15 = vpack.c.bf16 %v33_v13, %v31_v12  ;;  %v35_v18 = vld [vmem:[%s441_s2 + $0x68] sm:$0xff]  ;;  %v37_v19 = vld [vmem:[%s441_s2 + $0x78] sm:$0xff]  ;;  %v244_v20 = vpack.c.bf16 %v32_v17, %v30_v16  ;;  %v34_v22 = vld [vmem:[%s441_s2 + $0x60] sm:$0xff]  ;;  %v199_v55 = vsub.s32 3, %v129_v51  ;;  %v164_v8 = vstv %s445_s0 }
   0x6   :  { %239 = vmatprep.subr.bf16.mxu0 %v238_v9  ;;  %v246_v21 = vpack.c.bf16 %v37_v19, %v35_v18  ;;  %v36_v23 = vld [vmem:[%s441_s2 + $0x70] sm:$0xff]  ;;  %v39_v24 = vld [vmem:[%s441_s2 + $0x88] sm:$0xff]  ;;  %v41_v25 = vld [vmem:[%s441_s2 + $0x98] sm:$0xff] }
   0x7   :  { %v248_v26 = vpack.c.bf16 %v36_v23, %v34_v22  ;;  %v250_v27 = vpack.c.bf16 %v41_v25, %v39_v24  ;;  %v38_v28 = vld [vmem:[%s441_s2 + $0x80] sm:$0xff]  ;;  %v40_v29 = vld [vmem:[%s441_s2 + $0x90] sm:$0xff]  ;;  %v43_v30 = vld [vmem:[%s441_s2 + $0xa8] sm:$0xff] }
   0x8   :  { %v45_v31 = vld [vmem:[%s441_s2 + $0xb8] sm:$0xff]  ;;  %v252_v32 = vpack.c.bf16 %v40_v29, %v38_v28  ;;  %v42_v34 = vld [vmem:[%s441_s2 + $0xa0] sm:$0xff]  ;;  %v44_v35 = vld [vmem:[%s441_s2 + $0xb0] sm:$0xff] }
   0x9   :  { %241 = vmatpush1.bf16.msra.mxu0 %v240_v14  ;;  %v254_v33 = vpack.c.bf16 %v45_v31, %v43_v30  ;;  %v47_v36 = vld [vmem:[%s441_s2 + $0xc8] sm:$0xff]  ;;  %v49_v37 = vld [vmem:[%s441_s2 + $0xd8] sm:$0xff]  ;;  %v256_v38 = vpack.c.bf16 %v44_v35, %v42_v34  ;;  %v46_v40 = vld [vmem:[%s441_s2 + $0xc0] sm:$0xff] }
   0xa   :  { %243 = vmatprep.subr.bf16.mxu0 %v242_v15  ;;  %v258_v39 = vpack.c.bf16 %v49_v37, %v47_v36  ;;  %v48_v41 = vld [vmem:[%s441_s2 + $0xd0] sm:$0xff]  ;;  %v51_v42 = vld [vmem:[%s441_s2 + $0xe8] sm:$0xff]  ;;  %v53_v43 = vld [vmem:[%s441_s2 + $0xf8] sm:$0xff] }
   0xb   :  { %v260_v44 = vpack.c.bf16 %v48_v41, %v46_v40  ;;  %v262_v45 = vpack.c.bf16 %v53_v43, %v51_v42  ;;  %v50_v46 = vld [vmem:[%s441_s2 + $0xe0] sm:$0xff]  ;;  %v52_v47 = vld [vmem:[%s441_s2 + $0xf0] sm:$0xff]  ;;  %v226_v6 = vld [vmem:[%s443_s3 + $0x8] sm:$0xff] }
   0xc   :  { %v264_v48 = vpack.c.bf16 %v52_v47, %v50_v46  ;;  %v21_v49 = vld [vmem:[%s442_s1] sm:$0xff]  ;;  %v228_v0 = vld [vmem:[%s443_s3 + $0x10] sm:$0xff]  ;;  %v227_v7 = vld [vmem:[%s444_s4 + $0x8] sm:$0xff] }
   0xd   :  { %245 = vmatpush1.bf16.msra.mxu0 %v244_v20  ;;  %v126_v57 = vld [vmem:[%s443_s3] sm:$0xff]  ;;  %v229_v1 = vld [vmem:[%s444_s4 + $0x10] sm:$0xff]  ;;  %v230_v13 = vld [vmem:[%s443_s3 + $0x18] sm:$0xff] }
   0xe   :  { %247 = vmatprep.subr.bf16.mxu0 %v246_v21  ;;  %v127_v58 = vld [vmem:[%s444_s4] sm:$0xff]  ;;  %v231_v14 = vld [vmem:[%s444_s4 + $0x18] sm:$0xff] }
  0x11   :  { %249 = vmatpush1.bf16.msra.mxu0 %v248_v26 }
  0x12   :  { %251 = vmatprep.subr.bf16.mxu0 %v250_v27 }
  0x15   :  { %253 = vmatpush1.bf16.msra.mxu0 %v252_v32 }
  0x16   :  { %255 = vmatprep.subr.bf16.mxu0 %v254_v33 }
  0x19   :  { %257 = vmatpush1.bf16.msra.mxu0 %v256_v38 }
  0x1a   :  { %259 = vmatprep.subr.bf16.mxu0 %v258_v39 }
  0x1d   :  { %261 = vmatpush1.bf16.msra.mxu0 %v260_v44 }
  0x1e   :  { %263 = vmatprep.subr.bf16.mxu0 %v262_v45 }
  0x21   :  { %265 = vmatpush1.bf16.msra.mxu0 %v264_v48 }
  0x24   :  { %119 = vmatmul.mubr.f32.vlgmr.msra.gmra.mrb[0].mxu0 %v21_v49 }
  0xf7   :  { %v120_v56 = vpop.f32.mrb[0].mxu0 }
  0xf8   :  { %v122_v59 = vpop.f32.mrb[1].mxu0  ;;  %v131_v60 = vrot.slane %v120_v56, %v130_v52  ;;  %v180_v61 = vrot.slane %v120_v56, %v179_v53  ;;  %v151_v63 = vrot.slane %v120_v56, %v150_v54  ;;  %v200_v9 = vrot.slane %v120_v56, %v199_v55 }
  0xf9   :  { %v137_v62 = vrot.slane %v122_v59, %v130_v52  ;;  %v186_v2 = vrot.slane %v122_v59, %v179_v53  ;;  %v157_v12 = vrot.slane %v122_v59, %v150_v54  ;;  %v206_v15 = vrot.slane %v122_v59, %v199_v55 }
  0xfa   :  { %v132_v4 = vmul.f32 %v131_v60, %v126_v57  ;;  %v140_v5 = vmul.f32 %v131_v60, %v127_v58  ;;  %v181_v16 = vmul.f32 %v228_v0, %v180_v61  ;;  %v189_v18 = vmul.f32 %v229_v1, %v180_v61 }
  0xfb   :  { %v138_v10 = vmul.f32 %v137_v62, %v127_v58  ;;  %v142_v11 = vmul.f32 %v137_v62, %v126_v57  ;;  %v187_v17 = vmul.f32 %v229_v1, %v186_v2  ;;  %v191_v19 = vmul.f32 %v228_v0, %v186_v2 }
  0xfc   :  { %v152_v22 = vmul.f32 %v226_v6, %v151_v63  ;;  %v160_v23 = vmul.f32 %v227_v7, %v151_v63  ;;  %v201_v26 = vmul.f32 %v230_v13, %v200_v9  ;;  %v209_v27 = vmul.f32 %v231_v14, %v200_v9 }
  0xfd   :  { %v139_v20 = vadd.f32 %v138_v10, %v132_v4  ;;  %v143_v21 = vsub.f32 %v140_v5, %v142_v11  ;;  %v188_v24 = vadd.f32 %v187_v17, %v181_v16  ;;  %v192_v25 = vsub.f32 %v189_v18, %v191_v19 }
  0xfe   :  { %v158_v29 = vmul.f32 %v227_v7, %v157_v12  ;;  %v162_v31 = vmul.f32 %v226_v6, %v157_v12  ;;  %v207_v33 = vmul.f32 %v231_v14, %v206_v15  ;;  %v211_v35 = vmul.f32 %v230_v13, %v206_v15 }
  0xff   :  { %v153_v28 = vadd.f32 %v152_v22, %v139_v20  ;;  %v161_v30 = vadd.f32 %v160_v23, %v143_v21  ;;  %v202_v32 = vadd.f32 %v201_v26, %v188_v24  ;;  %v210_v34 = vadd.f32 %v209_v27, %v192_v25 }
 0x101   :  { %v159_v36 = vadd.f32 %v158_v29, %v153_v28  ;;  %v163_v37 = vsub.f32 %v161_v30, %v162_v31  ;;  %v208_v38 = vadd.f32 %v207_v33, %v202_v32  ;;  %v212_v39 = vsub.f32 %v210_v34, %v211_v35 }
 0x103   :  { %v165_v40 = vmul.f32 %v164_v8, %v159_v36  ;;  %v166_v41 = vmul.f32 %v164_v8, %v163_v37  ;;  %v213_v42 = vmul.f32 %v208_v38, %v164_v8  ;;  %v214_v43 = vmul.f32 %v212_v39, %v164_v8 }
 0x105   :  { %vm167_vm0 = vcmp.lt.f32.partialorder %v165_v40, 0.0  ;;  %vm169_vm1 = vcmp.lt.f32.partialorder %v166_v41, 0.0  ;;  %vm215_vm2 = vcmp.lt.f32.partialorder %v213_v42, 0.0  ;;  %vm217_vm3 = vcmp.lt.f32.partialorder %v214_v43, 0.0 }
 0x106   :  { %v168_v44 = vsel %vm167_vm0, 1.0, %v267_v3  ;;  %v170_v45 = vsel %vm169_vm1, 1.0, %v267_v3  ;;  %v216_v46 = vsel %vm215_vm2, 1.0, %v267_v3  ;;  %v218_v47 = vsel %vm217_vm3, 1.0, %v267_v3 }
 0x107   :  { %171 = vst [vmem:[%s446_s5] sm:$0xff] %v168_v44  ;;  %172 = vst [vmem:[%s446_s5 + $0x8] sm:$0xff] %v170_v45 }
 0x108   :  { %232 = vst [vmem:[%s446_s5 + $0x10] sm:$0xff] %v216_v46  ;;  %233 = vst [vmem:[%s446_s5 + $0x18] sm:$0xff] %v218_v47 }

</bundles_post_ra>
